<compile_context>
chip_gen: v6e
topology: v6e:2x2x1
jax: 0.10.0
libtpu: 0.0.40
codegen_flags: <defaults>
</compile_context>

<pallas_src>
import jax
import jax.numpy as jnp
from jax.experimental import pallas as pl
from jax.experimental.pallas import tpu as pltpu

RATIO = 16   # CBAM channel-reduction ratio (from the PyTorch module)
KSIZE = 7    # spatial-attention conv kernel size
PAD = 3      # spatial-attention conv padding


def _cbam_kernel(x_ref, w1_ref, w2_ref, k_ref, cb_ref, o_ref):
    x = x_ref[...]                                        # (B, C, HW) f32
    B, C, HW = x.shape

    # ---------------- Channel attention ----------------
    ch_max = jnp.max(x, axis=2)                           # (B, C)   lane reduce
    ch_mean = jnp.mean(x, axis=2)                         # (B, C)
    stats = jnp.concatenate([ch_max, ch_mean], axis=0)    # (2B, C)

    # Shared 2-layer 1x1-conv MLP, applied to max and mean stats at once.
    # dot_general contracts dim 1 of `stats`/`h` with dim 1 of the weights, so
    # the weights are used exactly as stored (no wrapper-side transposes).
    dn = (((1,), (1,)), ((), ()))
    h = jax.lax.dot_general(stats, w1_ref[...], dn,
                            preferred_element_type=jnp.float32)   # (2B, Cr)
    h = jnp.where(h >= 0.0, h, 0.1 * h)                   # LeakyReLU(0.1)
    o = jax.lax.dot_general(h, w2_ref[...], dn,
                            preferred_element_type=jnp.float32)   # (2B, C)
    ca = jax.nn.sigmoid(o[:B] + o[B:])                    # (B, C)

    cax = x * ca[:, :, None]                              # (B, C, HW) stays in vregs

    # ---------------- Spatial attention ----------------
    sp_max = jnp.max(cax, axis=1)                         # (B, HW)  sublane reduce
    sp_mean = jnp.mean(cax, axis=1)                       # (B, HW)
    sp = jnp.concatenate([sp_max, sp_mean], axis=1)       # (B, 2*HW) lane concat

    # 7x7 conv (2 -> 1 channels, padding 3) == one bf16 MXU matmul against the
    # fused (2*HW, HW) conv matrix (padding + both channel weights baked in).
    conv = jnp.dot(sp.astype(jnp.bfloat16), k_ref[...],
                   preferred_element_type=jnp.float32)    # (B, HW)
    sa = jax.nn.sigmoid(conv + cb_ref[0])                 # (B, HW)

    o_ref[...] = (cax * sa[:, None, :]).astype(o_ref.dtype)


def build_spatial_conv_matrix(conv_w, H, W):
    """Fused (2*H*W, H*W) bf16 matrix M so that [sp_max | sp_mean] @ M equals
    the 7x7 (padding=3) cross-correlation of the stacked 2-channel map,
    flattened over H*W.  Pure constant work per weight set — call once and
    reuse (hoisted out of the forward path per perf review)."""
    w = conv_w.reshape(2, KSIZE, KSIZE).astype(jnp.float32)        # (2, 7, 7)
    hw = H * W
    idx = jnp.arange(hw)
    ri, ci = idx // W, idx % W
    di = ri[:, None] - ri[None, :] + PAD                           # (HW, HW)
    dj = ci[:, None] - ci[None, :] + PAD                           # (HW, HW)
    valid = (di >= 0) & (di < KSIZE) & (dj >= 0) & (dj < KSIZE)
    di_c = jnp.where(valid, di, 0)
    dj_c = jnp.where(valid, dj, 0)
    k = w[:, di_c, dj_c] * valid[None].astype(jnp.float32)         # (2, HW, HW)
    return k.reshape(2 * hw, hw).astype(jnp.bfloat16)              # (2*HW, HW)


def _samples_per_step(n):
    """v7x has 2 TensorCores -> keep grid=(N,) so the 'parallel' batch axis is
    sharded across cores.  v5e/v6e have one core -> collapse the batch into a
    single grid step to avoid per-step grid overhead."""
    try:
        kind = jax.devices()[0].device_kind.lower()
    except Exception:  # pragma: no cover - defensive; fallback is still correct
        kind = ""
    if "v7" in kind or "7x" in kind:
        return 1
    return n


def cbam_forward(x, w1, w2, k_mat, conv_b):
    N, C, H, W = x.shape
    Cr = w1.shape[0]
    HW = H * W
    assert k_mat.shape == (2 * HW, HW), "precompute k_mat with build_spatial_conv_matrix"

    B = _samples_per_step(N)
    steps = N // B

    x2 = x.reshape(N, C, HW)                              # lane-dense view
    cb = conv_b.reshape(-1).astype(jnp.float32)           # (1,) scalar bias -> SMEM

    # VMEM budget derived from actual buffer sizes (double-buffered) + headroom.
    blk = B * C * HW * 4                                  # one activation block (f32)
    kb = k_mat.size * k_mat.dtype.itemsize                # bf16 fused conv matrix
    wb = (w1.size + w2.size) * 4
    vmem_limit = 2 * (2 * blk + kb + wb) + 4 * 1024 * 1024

    out2 = pl.pallas_call(
        _cbam_kernel,
        out_shape=jax.ShapeDtypeStruct((N, C, HW), x.dtype),
        grid_spec=pltpu.PrefetchScalarGridSpec(
            num_scalar_prefetch=0,
            grid=(steps,),
            in_specs=[
                pl.BlockSpec((B, C, HW), lambda b: (b, 0, 0)),        # activations
                pl.BlockSpec((Cr, C), lambda b: (0, 0)),              # MLP w1
                pl.BlockSpec((C, Cr), lambda b: (0, 0)),              # MLP w2
                pl.BlockSpec((2 * HW, HW), lambda b: (0, 0)),         # fused conv matrix (bf16)
                pl.BlockSpec(memory_space=pltpu.MemorySpace.SMEM),    # conv bias scalar
            ],
            out_specs=pl.BlockSpec((B, C, HW), lambda b: (b, 0, 0)),
        ),
        compiler_params=pltpu.CompilerParams(
            dimension_semantics=("parallel",),
            vmem_limit_bytes=vmem_limit,
        ),
    )(x2, w1, w2, k_mat, cb)

    return out2.reshape(N, C, H, W)


def cbam_reference(x, w1, w2, conv_w, conv_b):
    """Pure-JAX reference matching the PyTorch CBAM.forward exactly."""
    hp = jax.lax.Precision.HIGHEST
    ch_max = jnp.max(x, axis=(2, 3), keepdims=True)
    ch_mean = jnp.mean(x, axis=(2, 3), keepdims=True)

    def mlp(v):
        h = jnp.einsum("rc,ncij->nrij", w1, v, precision=hp)
        h = jnp.where(h >= 0, h, 0.1 * h)
        return jnp.einsum("cr,nrij->ncij", w2, h, precision=hp)

    ca = jax.nn.sigmoid(mlp(ch_max) + mlp(ch_mean))
    cax = ca * x

    sp_max = jnp.max(cax, axis=1, keepdims=True)
    sp_mean = jnp.mean(cax, axis=1, keepdims=True)
    comb = jnp.concatenate([sp_max, sp_mean], axis=1)
    out = jax.lax.conv_general_dilated(
        comb, conv_w, (1, 1), ((PAD, PAD), (PAD, PAD)),
        dimension_numbers=("NCHW", "OIHW", "NCHW"), precision=hp)
    sa = jax.nn.sigmoid(out + conv_b.reshape(1, 1, 1, 1))
    return sa * cax


if __name__ == "__main__":
    N, C, H, W = 2, 32, 16, 16          # C must be >= RATIO (C // 16 >= 1)
    Cr = C // RATIO

    key = jax.random.PRNGKey(0)
    kx, k1, k2, k3, k4 = jax.random.split(key, 5)
    x = jax.random.normal(kx, (N, C, H, W), jnp.float32)
    # Deterministic synthetic parameters (shapes from the nn.Module __init__):
    w1 = jax.random.normal(k1, (Cr, C), jnp.float32) * (1.0 / jnp.sqrt(C))       # Conv2d(C, C//16, 1, bias=False)
    w2 = jax.random.normal(k2, (C, Cr), jnp.float32) * (1.0 / jnp.sqrt(Cr))      # Conv2d(C//16, C, 1, bias=False)
    conv_w = jax.random.normal(k3, (1, 2, KSIZE, KSIZE), jnp.float32) * 0.1      # Conv2d(2, 1, 7, padding=3).weight
    conv_b = jax.random.normal(k4, (1,), jnp.float32) * 0.1                      # Conv2d(2, 1, 7, padding=3).bias

    # Conv matrix is precomputed ONCE per weight set (hoisted out of forward).
    k_mat = jax.block_until_ready(build_spatial_conv_matrix(conv_w, H, W))

    out = cbam_forward(x, w1, w2, k_mat, conv_b)
    out = jax.block_until_ready(out)

    ref = cbam_reference(x, w1, w2, conv_w, conv_b)
    assert out.shape == ref.shape and out.dtype == ref.dtype
    err = float(jnp.max(jnp.abs(out - ref)))
    # The fused spatial-conv matrix (and its MXU inputs) are bf16 and the MLP
    # dots run at TPU default matmul precision vs. the HIGHEST-precision f32
    # reference: tolerance covers bf16 quantization over the 98-tap conv.
    assert jnp.allclose(out, ref, rtol=1e-2, atol=1e-2), "max abs err = %g" % err

    print("KERNEL_OK")
</pallas_src>

<mosaic_0001>
module attributes {stable_mosaic.version = 11 : i64} {
  func.func @_cbam_kernel(%arg0: i32, %arg1: memref<2x32x256xf32, #tpu.memory_space<vmem>>, %arg2: memref<2x32xf32, #tpu.memory_space<vmem>>, %arg3: memref<32x2xf32, #tpu.memory_space<vmem>>, %arg4: memref<512x256xbf16, #tpu.memory_space<vmem>>, %arg5: memref<1xf32, #tpu.memory_space<smem>>, %arg6: memref<2x32x256xf32, #tpu.memory_space<vmem>>) attributes {dimension_semantics = [#tpu.dimension_semantics<parallel>], iteration_bounds = array<i64: 1>, scalar_prefetch = 0 : i64, scratch_operands = 0 : i64, tpu.core_type = #tpu.core_type<tc>, window_params = [{transform_indices = @transform_0, window_bounds = array<i64: 2, 32, 256>}, {pipeline_mode = #tpu.pipeline_mode<synchronous>, transform_indices = @transform_1, window_bounds = array<i64: 2, 32>}, {pipeline_mode = #tpu.pipeline_mode<synchronous>, transform_indices = @transform_2, window_bounds = array<i64: 32, 2>}, {pipeline_mode = #tpu.pipeline_mode<synchronous>, transform_indices = @transform_3, window_bounds = array<i64: 512, 256>}, {transform_indices = @transform_4, window_bounds = array<i64: 1>}, {transform_indices = @transform_5, window_bounds = array<i64: 2, 32, 256>}]} {
    %c0 = arith.constant 0 : index
    %c0_0 = arith.constant 0 : index
    %c0_1 = arith.constant 0 : index
    %0 = vector.load %arg1[%c0, %c0_0, %c0_1] : memref<2x32x256xf32, #tpu.memory_space<vmem>>, vector<2x32x256xf32>
    %cst = arith.constant dense<0xFF800000> : vector<2x32xf32>
    %1 = vector.multi_reduction <maximumf>, %0, %cst [2] : vector<2x32x256xf32> to vector<2x32xf32>
    %cst_2 = arith.constant dense<0.000000e+00> : vector<2x32xf32>
    %2 = vector.multi_reduction <add>, %0, %cst_2 [2] : vector<2x32x256xf32> to vector<2x32xf32>
    %cst_3 = arith.constant 2.560000e+02 : f32
    %3 = vector.broadcast %cst_3 : f32 to vector<2x32xf32>
    %4 = arith.divf %2, %3 : vector<2x32xf32>
    %5 = tpu.concatenate %1, %4 in 0 : vector<2x32xf32>, vector<2x32xf32> -> vector<4x32xf32>
    %c0_4 = arith.constant 0 : index
    %c0_5 = arith.constant 0 : index
    %6 = vector.load %arg2[%c0_4, %c0_5] : memref<2x32xf32, #tpu.memory_space<vmem>>, vector<2x32xf32>
    %cst_6 = arith.constant dense<0.000000e+00> : vector<4x2xf32>
    %7 = tpu.matmul %5, %6, %cst_6 {dimension_numbers = #tpu.dot_dimension_numbers<[1], [1], [0], [0], [0, 0, 1, 0], [], []>} : vector<4x32xf32>, vector<2x32xf32>, vector<4x2xf32> -> vector<4x2xf32>
    %cst_7 = arith.constant 0.000000e+00 : f32
    %8 = vector.broadcast %cst_7 : f32 to vector<4x2xf32>
    %9 = arith.cmpf oge, %7, %8 : vector<4x2xf32>
    %cst_8 = arith.constant 1.000000e-01 : f32
    %10 = vector.broadcast %cst_8 : f32 to vector<4x2xf32>
    %11 = arith.mulf %10, %7 : vector<4x2xf32>
    %12 = arith.select %9, %7, %11 : vector<4x2xi1>, vector<4x2xf32>
    %c0_9 = arith.constant 0 : index
    %c0_10 = arith.constant 0 : index
    %13 = vector.load %arg3[%c0_9, %c0_10] : memref<32x2xf32, #tpu.memory_space<vmem>>, vector<32x2xf32>
    %cst_11 = arith.constant dense<0.000000e+00> : vector<4x32xf32>
    %14 = tpu.matmul %12, %13, %cst_11 {dimension_numbers = #tpu.dot_dimension_numbers<[1], [1], [0], [0], [0, 0, 1, 0], [], []>} : vector<4x2xf32>, vector<32x2xf32>, vector<4x32xf32> -> vector<4x32xf32>
    %15 = vector.extract_strided_slice %14 {offsets = [0, 0], sizes = [2, 32], strides = [1, 1]} : vector<4x32xf32> to vector<2x32xf32>
    %16 = vector.extract_strided_slice %14 {offsets = [2, 0], sizes = [2, 32], strides = [1, 1]} : vector<4x32xf32> to vector<2x32xf32>
    %17 = arith.addf %15, %16 : vector<2x32xf32>
    %18 = arith.negf %17 : vector<2x32xf32>
    %19 = math.exp %18 : vector<2x32xf32>
    %cst_12 = arith.constant 1.000000e+00 : f32
    %20 = vector.broadcast %cst_12 : f32 to vector<2x32xf32>
    %21 = arith.addf %20, %19 : vector<2x32xf32>
    %22 = arith.divf %20, %21 : vector<2x32xf32>
    %23 = vector.shape_cast %22 : vector<2x32xf32> to vector<2x32x1xf32>
    %24 = vector.broadcast %23 : vector<2x32x1xf32> to vector<2x32x256xf32>
    %25 = arith.mulf %0, %24 : vector<2x32x256xf32>
    %cst_13 = arith.constant dense<0xFF800000> : vector<2x256xf32>
    %26 = vector.multi_reduction <maximumf>, %25, %cst_13 [1] : vector<2x32x256xf32> to vector<2x256xf32>
    %cst_14 = arith.constant dense<0.000000e+00> : vector<2x256xf32>
    %27 = vector.multi_reduction <add>, %25, %cst_14 [1] : vector<2x32x256xf32> to vector<2x256xf32>
    %cst_15 = arith.constant 3.200000e+01 : f32
    %28 = vector.broadcast %cst_15 : f32 to vector<2x256xf32>
    %29 = arith.divf %27, %28 : vector<2x256xf32>
    %30 = tpu.concatenate %26, %29 in 1 : vector<2x256xf32>, vector<2x256xf32> -> vector<2x512xf32>
    %31 = arith.truncf %30 : vector<2x512xf32> to vector<2x512xbf16>
    %c0_16 = arith.constant 0 : index
    %c0_17 = arith.constant 0 : index
    %32 = vector.load %arg4[%c0_16, %c0_17] : memref<512x256xbf16, #tpu.memory_space<vmem>>, vector<512x256xbf16>
    %cst_18 = arith.constant dense<0.000000e+00> : vector<2x256xf32>
    %33 = tpu.matmul %31, %32, %cst_18 {dimension_numbers = #tpu.dot_dimension_numbers<[1], [0], [0], [1], [0, 0, 1, 1], [], []>} : vector<2x512xbf16>, vector<512x256xbf16>, vector<2x256xf32> -> vector<2x256xf32>
    %c0_19 = arith.constant 0 : index
    %34 = memref.load %arg5[%c0_19] : memref<1xf32, #tpu.memory_space<smem>>
    %35 = vector.broadcast %34 : f32 to vector<2x256xf32>
    %36 = arith.addf %33, %35 : vector<2x256xf32>
    %37 = arith.negf %36 : vector<2x256xf32>
    %38 = math.exp %37 : vector<2x256xf32>
    %cst_20 = arith.constant 1.000000e+00 : f32
    %39 = vector.broadcast %cst_20 : f32 to vector<2x256xf32>
    %40 = arith.addf %39, %38 : vector<2x256xf32>
    %41 = arith.divf %39, %40 : vector<2x256xf32>
    %42 = vector.shape_cast %41 : vector<2x256xf32> to vector<2x1x256xf32>
    %43 = vector.broadcast %42 : vector<2x1x256xf32> to vector<2x32x256xf32>
    %44 = arith.mulf %25, %43 : vector<2x32x256xf32>
    %c0_21 = arith.constant 0 : index
    %c0_22 = arith.constant 0 : index
    %c0_23 = arith.constant 0 : index
    %45 = vector.load %arg6[%c0_21, %c0_22, %c0_23] : memref<2x32x256xf32, #tpu.memory_space<vmem>>, vector<2x32x256xf32>
    tpu.vector_store %arg6[%c0_21, %c0_22, %c0_23], %44 {strides = array<i32>} : memref<2x32x256xf32, #tpu.memory_space<vmem>>, vector<2x32x256xf32>,
    return
  }
  func.func @transform_0(%arg0: i32) -> (i32, i32, i32) {
    %c0_i32 = arith.constant 0 : i32
    %c0_i32_0 = arith.constant 0 : i32
    %c0_i32_1 = arith.constant 0 : i32
    return %arg0, %c0_i32, %c0_i32_0 : i32, i32, i32
  }
  func.func @transform_1(%arg0: i32) -> (i32, i32) {
    %c0_i32 = arith.constant 0 : i32
    %c0_i32_0 = arith.constant 0 : i32
    %c0_i32_1 = arith.constant 0 : i32
    return %c0_i32, %c0_i32_0 : i32, i32
  }
  func.func @transform_2(%arg0: i32) -> (i32, i32) {
    %c0_i32 = arith.constant 0 : i32
    %c0_i32_0 = arith.constant 0 : i32
    %c0_i32_1 = arith.constant 0 : i32
    return %c0_i32, %c0_i32_0 : i32, i32
  }
  func.func @transform_3(%arg0: i32) -> (i32, i32) {
    %c0_i32 = arith.constant 0 : i32
    %c0_i32_0 = arith.constant 0 : i32
    %c0_i32_1 = arith.constant 0 : i32
    return %c0_i32, %c0_i32_0 : i32, i32
  }
  func.func @transform_4(%arg0: i32) -> i32 {
    %c0_i32 = arith.constant 0 : i32
    %c0_i32_0 = arith.constant 0 : i32
    return %c0_i32 : i32
  }
  func.func @transform_5(%arg0: i32) -> (i32, i32, i32) {
    %c0_i32 = arith.constant 0 : i32
    %c0_i32_0 = arith.constant 0 : i32
    %c0_i32_1 = arith.constant 0 : i32
    return %arg0, %c0_i32, %c0_i32_0 : i32, i32, i32
  }
}

</mosaic_0001>

<bundles_post_ra>
// kernel: tpu_custom_call.1
= control target key start
LH: loop header
LB: loop body
LE: loop exit
PB: predicated region body
PF: predicated region fallthrough
CT: control target
= control target key end

     0   :  { %11 = vsyncpa [#allocation4], 0  ;;  %s1695_s0 = inlined_call_operand.hbm [shape: f32[2,32,256], index: 0, kind: input, shape index: {}]   ;;  %s1696_s1 = inlined_call_operand.vmem [shape: f32[2,32], index: 1, kind: input, shape index: {}]   ;;  %s1697_s2 = inlined_call_operand.vmem [shape: f32[32,2], index: 2, kind: input, shape index: {}]   ;;  %s1698_s3 = inlined_call_operand.hbm [shape: bf16[512,256], index: 3, kind: input, shape index: {}]   ;;  %s1699_s4 = inlined_call_operand.<no memory space> [shape: f32[1], index: 4, kind: input, shape index: {}]   ;;  %s1700_s5 = inlined_call_operand.hbm [shape: f32[2,32,256], index: 5, kind: output, shape index: {}]  }
   0x1   :  { %12 = vsyncpa [#allocation7], 0 }
   0x2   :  { %13 = vsyncpa [#allocation5], 0  ;;  %s1419_s18 = smov [#allocation3]  }
   0x3   :  { %s19_s19 = sshll.u32 %s1419_s18, 4  ;;  %s20_s19 = int_to_ptr.vmem [resolvable:$true] %s19_s19 }
   0x4   :  { %s1361_s20 = scalar_lea.vmem %s20_s19, 2048  ;;  %p1366_p1 = scmp.lt.s32.totalorder %s20_s19, %s20_s19 }
   0x5   :  { %p1362_p0 = scmp.ne.s32.totalorder %s20_s19, %s1361_s20  ;;  %p1367_p2 = scmp.lt.s32.totalorder %s1361_s20, %s1361_s20 }
   0x7   :  { %p1368_p3 = por %p1367_p2, %p1366_p1 }
   0x9   :  { %p1369_p4 = pnand %p1368_p3, %p1362_p0 }
   0xb   :  { %1372 = shalt.err (!%p1369_p4)
}
   0xc   :  { %s1420_s21 = smov 256   ;;  %s1421_s22 = smov 16  }
   0xd   :  { %25 = dma.hbm_to_vmem [thread:$0]  %s1695_s0, 2048, %s20_s19, [#allocation4], %s1420_s21, %s1420_s21, %s1421_s22  }
   0xe   :  { %s1422_s25 = smov [#allocation6]  }
   0xf   :  { %s35_s26 = sshll.u32 %s1422_s25, 4  ;;  %s36_s26 = int_to_ptr.vmem [resolvable:$true] %s35_s26 }
  0x10   :  { %s1381_s27 = scalar_lea.vmem %s36_s26, 8192  ;;  %p1386_p6 = scmp.lt.s32.totalorder %s36_s26, %s36_s26 }
  0x11   :  { %p1382_p5 = scmp.ne.s32.totalorder %s36_s26, %s1381_s27  ;;  %p1387_p7 = scmp.lt.s32.totalorder %s1381_s27, %s1381_s27 }
  0x13   :  { %p1388_p8 = por %p1387_p7, %p1386_p6 }
  0x15   :  { %p1389_p9 = pnand %p1388_p8, %p1382_p5 }
  0x17   :  { %1392 = shalt.err (!%p1389_p9)
}
  0x18   :  { %s1423_s28 = smov 128   ;;  %s1424_s29 = smov 8  }
  0x19   :  { %41 = dma.hbm_to_vmem [thread:$0]  %s1698_s3, 8192, %s36_s26, [#allocation7], %s1423_s28, %s1423_s28, %s1424_s29  }
  0x1a   :  { %1413 = dma.done.wait [#allocation4], 2048  }
  0x1b   :  { %1414 = vsyncadd [#allocation4], 4294965248 }
  0x1c   :  { %1415 = dma.done.wait [#allocation7], 8192  }
  0x1d   :  { %1416 = vsyncadd [#allocation7], 4294959104  ;;  %v1468_v0 = vld [vmem:[#allocation3 + $0x40] sm:$0xff]  ;;  %v1470_v1 = vld [vmem:[#allocation3 + $0x48] sm:$0xff]  ;;  %v1425_v32 = vmov 0.0   ;;  %vm232_vm0 = vcmask 261120   ;;  %v131_v42 = vlaneseq }
  0x1e   :  { %v1472_v2 = vld [vmem:[#allocation3] sm:$0xff]  ;;  %v102_v3 = vadd.f32 %v1470_v1, %v1468_v0  ;;  %v1476_v4 = vld [vmem:[#allocation3 + $0x8] sm:$0xff]  ;;  %v1478_v5 = vld [vmem:[#allocation3 + $0x50] sm:$0xff]  ;;  %v78_v25 = vmax.f32 %v1468_v0, %v1470_v1  ;;  %1219 = vmatprep.subr.mxu0 %v1425_v32  ;;  %1224 = vmatprep.subr.mxu1 %v1425_v32  ;;  %vm1426_vm1 = vmmov 0   ;;  %vm316_vm2 = vcmask 15360  }
  0x1f   :  { %v1480_v6 = vld [vmem:[#allocation3 + $0x58] sm:$0xff]  ;;  %v90_v7 = vadd.f32 %v1476_v4, %v1472_v2  ;;  %v1484_v8 = vld [vmem:[#allocation3 + $0x10] sm:$0xff]  ;;  %v1492_v12 = vld [vmem:[#allocation3 + $0x60] sm:$0xff]  ;;  %v66_v19 = vmax.f32 %v1472_v2, %v1476_v4  ;;  %1221 = vmatprep.mubr.msk.f32.mxu0 %vm1426_vm1, %v1425_v32  ;;  %1232 = vmatprep.mubr.msk.f32.mxu1 %vm1426_vm1, %v1425_v32  ;;  %v132_v45 = vand.u32 127, %v131_v42  ;;  %v1548_v47 = vshrl.u32 %v131_v42, 7 }
  0x20   :  { %v1486_v9 = vld [vmem:[#allocation3 + $0x18] sm:$0xff]  ;;  %103 = vadd.xlane.f32.xlu1 %v102_v3  ;;  %v105_v10 = vadd.f32 %v1480_v6, %v1478_v5  ;;  %v1494_v13 = vld [vmem:[#allocation3 + $0x68] sm:$0xff]  ;;  %v1496_v14 = vld [vmem:[#allocation3 + $0x20] sm:$0xff]  ;;  %v81_v22 = vmax.f32 %v1478_v5, %v1480_v6  ;;  %vm142_vm3 = vcmask 130112   ;;  %vm149_vm4 = vcmask 195712  }
  0x21   :  { %91 = vadd.xlane.f32.xlu0 %v90_v7  ;;  %v93_v11 = vadd.f32 %v1486_v9, %v1484_v8  ;;  %v1498_v15 = vld [vmem:[#allocation3 + $0x28] sm:$0xff]  ;;  %v108_v16 = vadd.f32 %v1494_v13, %v1492_v12  ;;  %v69_v18 = vmax.f32 %v1484_v8, %v1486_v9  ;;  %v1508_v20 = vld [vmem:[#allocation3 + $0x70] sm:$0xff]  ;;  %v1510_v21 = vld [vmem:[#allocation3 + $0x78] sm:$0xff]  ;;  %v84_v28 = vmax.f32 %v1492_v12, %v1494_v13 }
  0x22   :  { %v96_v17 = vadd.f32 %v1498_v15, %v1496_v14  ;;  %v1514_v23 = vld [vmem:[#allocation3 + $0x30] sm:$0xff]  ;;  %v1516_v24 = vld [vmem:[#allocation3 + $0x38] sm:$0xff]  ;;  %v111_v26 = vadd.f32 %v1510_v21, %v1508_v20  ;;  %v72_v29 = vmax.f32 %v1496_v14, %v1498_v15  ;;  %v87_v30 = vmax.f32 %v1508_v20, %v1510_v21  ;;  %v231_v33 = vld [vmem:[%s1696_s1] sm:$0x3] }
  0x23   :  { %v99_v27 = vadd.f32 %v1516_v24, %v1514_v23  ;;  %v75_v31 = vmax.f32 %v1514_v23, %v1516_v24  ;;  %1220 = vmatpush3.xpose.msk.msra.mxu0 %vm232_vm0, %v231_v33  ;;  %v315_v34 = vld [vmem:[%s1697_s2 + $0x18] sm:$0xff]  ;;  %v314_v35 = vld [vmem:[%s1697_s2 + $0x10] sm:$0xff]  ;;  %v313_v36 = vld [vmem:[%s1697_s2 + $0x8] sm:$0xff]  ;;  %v137_v48 = vadd.s32 4294967288, %v132_v45  ;;  %v144_v49 = vadd.s32 4294967280, %v132_v45 }
  0x24   :  { %106 = vadd.xlane.f32.xlu1 %v105_v10  ;;  %1225 = vmatpush3.xpose.msk.msra.mxu1 %vm316_vm2, %v315_v34  ;;  %v151_v52 = vadd.s32 4294967272, %v132_v45  ;;  %v135_v53 = vsub.s32 %v132_v45, %v1548_v47  ;;  %vm156_vm5 = vcmask 261312   ;;  %vm177_vm6 = vcmask 1041409  }
  0x25   :  { %94 = vadd.xlane.f32.xlu0 %v93_v11  ;;  %1226 = vmatprep.subr.mxu1 %v1425_v32  ;;  %v140_v54 = vsub.s32 %v137_v48, %v1548_v47  ;;  %v147_v56 = vsub.s32 %v144_v49, %v1548_v47  ;;  %vm226_vm7 = vcmask 1043459   ;;  %vm229_vm8 = vcmask 1041408  }
  0x26   :  { %v154_v3 = vsub.s32 %v151_v52, %v1548_v47 }
  0x28   :  { %109 = vadd.xlane.f32.xlu1 %v108_v16  ;;  %1227 = vmatpush3.xpose.msk.msra.mxu1 %vm316_vm2, %v314_v35 }
  0x29   :  { %97 = vadd.xlane.f32.xlu0 %v96_v17  ;;  %1228 = vmatprep.subr.mxu1 %v1425_v32 }
  0x2c   :  { %70 = vmax.xlane.f32.xlu1 %v69_v18  ;;  %1229 = vmatpush3.xpose.msk.msra.mxu1 %vm316_vm2, %v313_v36 }
  0x2d   :  { %67 = vmax.xlane.f32.xlu0 %v66_v19  ;;  %1230 = vmatprep.subr.mxu1 %v1425_v32 }
  0x30   :  { %82 = vmax.xlane.f32.xlu1 %v81_v22 }
  0x31   :  { %79 = vmax.xlane.f32.xlu0 %v78_v25 }
  0x34   :  { %112 = vadd.xlane.f32.xlu1 %v111_v26 }
  0x35   :  { %100 = vadd.xlane.f32.xlu0 %v99_v27 }
  0x38   :  { %85 = vmax.xlane.f32.xlu1 %v84_v28 }
  0x39   :  { %73 = vmax.xlane.f32.xlu0 %v72_v29 }
  0x3c   :  { %88 = vmax.xlane.f32.xlu1 %v87_v30 }
  0x3d   :  { %76 = vmax.xlane.f32.xlu0 %v75_v31 }
  0xa9   :  { %v104_v37 = vpop.xlane.xlu1 %103 }
  0xaa   :  { %v92_v38 = vpop.xlane.xlu0 %91  ;;  %v119_v57 = vmul.f32 0.00390625, %v104_v37 }
  0xab   :  { %v115_v63 = vmul.f32 0.00390625, %v92_v38 }
  0xac   :  { %v210_v16 = vrot.slane %v119_v57, %v135_v53 }
  0xad   :  { %v107_v39 = vpop.xlane.xlu1 %106  ;;  %v191_v30 = vrot.slane %v115_v63, %v135_v53  ;;  %v1250_v63 = vld [vmem:[#allocation6 + $0x174] ss:$8 sps:$4 sm:$0xff]  }
  0xae   :  { %v95_v40 = vpop.xlane.xlu0 %94  ;;  %v120_v55 = vmul.f32 0.00390625, %v107_v39 }
  0xaf   :  { %v116_v58 = vmul.f32 0.00390625, %v95_v40 }
  0xb0   :  { %v214_v11 = vrot.slane %v120_v55, %v140_v54  ;;  %v312_v55 = vld [vmem:[%s1697_s2] sm:$0xff] }
  0xb1   :  { %v110_v41 = vpop.xlane.xlu1 %109  ;;  %v195_v17 = vrot.slane %v116_v58, %v140_v54  ;;  %1231 = vmatpush3.xpose.msk.msra.mxu1 %vm316_vm2, %v312_v55  ;;  %v1296_v55 = vld [vmem:[#allocation6 + $0x1f0] ss:$8 sps:$4 sm:$0xff]  }
  0xb2   :  { %v98_v43 = vpop.xlane.xlu0 %97  ;;  %v121_v59 = vmul.f32 0.00390625, %v110_v41  ;;  %v215_v34 = vsel %vm142_vm3, %v214_v11, %v210_v16  ;;  %990 = vmatprep.subr.bf16.mxu1 %v1250_v63  ;;  %v1254_v11 = vld [vmem:[#allocation6 + $0x160] ss:$8 sps:$4 sm:$0xff]   ;;  %v1259_v16 = vld [vmem:[#allocation6 + $0x54] ss:$8 sps:$4 sm:$0xff]   ;;  %v1578_v63 = vsub.s32 1, %v1548_v47 }
  0xb3   :  { %v117_v60 = vmul.f32 0.00390625, %v98_v43  ;;  %v196_v36 = vsel %vm142_vm3, %v195_v17, %v191_v30  ;;  %v1262_v17 = vld [vmem:[#allocation6 + $0x154] ss:$8 sps:$4 sm:$0xff]   ;;  %v1269_v30 = vld [vmem:[#allocation6 + $0x30] ss:$8 sps:$4 sm:$0xff]  }
  0xb4   :  { %v219_v18 = vrot.slane %v121_v59, %v147_v56 }
  0xb5   :  { %v71_v44 = vpop.xlane.xlu1 %70  ;;  %v200_v19 = vrot.slane %v117_v60, %v147_v56  ;;  %v1245_v60 = vld [vmem:[#allocation6 + $0x70] ss:$8 sps:$4 sm:$0xff]  }
  0xb6   :  { %v68_v46 = vpop.xlane.xlu0 %67  ;;  %v141_v25 = vrot.slane %v71_v44, %v140_v54  ;;  %v220_v37 = vsel %vm149_vm4, %v219_v18, %v215_v34  ;;  %v1257_v18 = vld [vmem:[#allocation6 + $0x50] ss:$8 sps:$4 sm:$0xff]   ;;  %v1275_v34 = vld [vmem:[#allocation6 + $0x20] ss:$8 sps:$4 sm:$0xff]  }
  0xb7   :  { %v136_v26 = vrot.slane %v68_v46, %v135_v53  ;;  %v201_v39 = vsel %vm149_vm4, %v200_v19, %v196_v36  ;;  %v1260_v19 = vld [vmem:[#allocation6 + $0x150] ss:$8 sps:$4 sm:$0xff]   ;;  %v1283_v36 = vld [vmem:[#allocation6 + $0x14] ss:$8 sps:$4 sm:$0xff]  }
  0xb9   :  { %v83_v50 = vpop.xlane.xlu1 %82  ;;  %v143_v40 = vsel %vm142_vm3, %v141_v25, %v136_v26  ;;  %v1268_v25 = vld [vmem:[#allocation6 + $0x144] ss:$8 sps:$4 sm:$0xff]   ;;  %v1263_v26 = vld [vmem:[#allocation6 + $0x40] ss:$8 sps:$4 sm:$0xff]  }
  0xba   :  { %v80_v51 = vpop.xlane.xlu0 %79  ;;  %v165_v27 = vrot.slane %v83_v50, %v140_v54 }
  0xbb   :  { %v161_v28 = vrot.slane %v80_v51, %v135_v53 }
  0xbd   :  { %v113_v61 = vpop.xlane.xlu1 %112  ;;  %v166_v41 = vsel %vm142_vm3, %v165_v27, %v161_v28  ;;  %v1266_v27 = vld [vmem:[#allocation6 + $0x140] ss:$8 sps:$4 sm:$0xff]   ;;  %v1271_v28 = vld [vmem:[#allocation6 + $0x34] ss:$8 sps:$4 sm:$0xff]  }
  0xbe   :  { %v101_v62 = vpop.xlane.xlu0 %100  ;;  %v122_v7 = vmul.f32 0.00390625, %v113_v61  ;;  %v1247_v61 = vld [vmem:[#allocation6 + $0x74] ss:$8 sps:$4 sm:$0xff]  }
  0xbf   :  { %v118_v10 = vmul.f32 0.00390625, %v101_v62  ;;  %v1248_v62 = vld [vmem:[#allocation6 + $0x170] ss:$8 sps:$4 sm:$0xff]   ;;  %949 = vmatprep.subr.bf16.mxu0 %v1247_v61  ;;  %v1302_v61 = vld [vmem:[#allocation6 + $0x1e0] ss:$8 sps:$4 sm:$0xff]  }
  0xc0   :  { %v224_v31 = vrot.slane %v122_v7, %v154_v3  ;;  %v1256_v7 = vld [vmem:[#allocation6 + $0x164] ss:$8 sps:$4 sm:$0xff]  }
  0xc1   :  { %v86_v22 = vpop.xlane.xlu1 %85  ;;  %v205_v32 = vrot.slane %v118_v10, %v154_v3  ;;  %v1251_v10 = vld [vmem:[#allocation6 + $0x60] ss:$8 sps:$4 sm:$0xff]  }
  0xc2   :  { %v74_v29 = vpop.xlane.xlu0 %73  ;;  %v170_v33 = vrot.slane %v86_v22, %v147_v56  ;;  %v225_v44 = vsel %vm156_vm5, %v224_v31, %v220_v37  ;;  %v1265_v22 = vld [vmem:[#allocation6 + $0x44] ss:$8 sps:$4 sm:$0xff]   ;;  %v1272_v31 = vld [vmem:[#allocation6 + $0x130] ss:$8 sps:$4 sm:$0xff]   ;;  %v1286_v37 = vld [vmem:[#allocation6 + $0x114] ss:$8 sps:$4 sm:$0xff]  }
  0xc3   :  { %v148_v35 = vrot.slane %v74_v29, %v147_v56  ;;  %v206_v45 = vsel %vm156_vm5, %v205_v32, %v201_v39  ;;  %v1274_v29 = vld [vmem:[#allocation6 + $0x134] ss:$8 sps:$4 sm:$0xff]   ;;  %v1277_v32 = vld [vmem:[#allocation6 + $0x24] ss:$8 sps:$4 sm:$0xff]   ;;  %v1284_v39 = vld [vmem:[#allocation6 + $0x110] ss:$8 sps:$4 sm:$0xff]  }
  0xc4   :  { %v171_v46 = vsel %vm149_vm4, %v170_v33, %v166_v41  ;;  %v227_v53 = vsel %vm226_vm7, %v225_v44, %v206_v45  ;;  %v1280_v33 = vld [vmem:[#allocation6 + $0x124] ss:$8 sps:$4 sm:$0xff]  }
  0xc5   :  { %v89_v38 = vpop.xlane.xlu1 %88  ;;  %v150_v49 = vsel %vm149_vm4, %v148_v35, %v143_v40  ;;  %v1278_v35 = vld [vmem:[#allocation6 + $0x120] ss:$8 sps:$4 sm:$0xff]  }
  0xc6   :  { %v175_v42 = vrot.slane %v89_v38, %v154_v3  ;;  %v77_v43 = vpop.xlane.xlu0 %76  ;;  %v1281_v38 = vld [vmem:[#allocation6 + $0x10] ss:$8 sps:$4 sm:$0xff]  }
  0xc7   :  { %v155_v48 = vrot.slane %v77_v43, %v154_v3  ;;  %v1253_v3 = vld [vmem:[#allocation6 + $0x64] ss:$8 sps:$4 sm:$0xff]  }
  0xc8   :  { %v176_v50 = vsel %vm156_vm5, %v175_v42, %v171_v46 }
  0xc9   :  { %v157_v51 = vsel %vm156_vm5, %v155_v48, %v150_v49  ;;  %v1289_v48 = vld [vmem:[#allocation6 + $0x4] ss:$8 sps:$4 sm:$0xff]   ;;  %v1287_v49 = vld [vmem:[#allocation6] ss:$8 sps:$4 sm:$0xff]  }
  0xca   :  { %v178_v52 = vsel %vm177_vm6, %v176_v50, %v157_v51  ;;  %v1292_v50 = vld [vmem:[#allocation6 + $0x104] ss:$8 sps:$4 sm:$0xff]   ;;  %v1290_v51 = vld [vmem:[#allocation6 + $0x100] ss:$8 sps:$4 sm:$0xff]  }
  0xcb   :  { %v230_v54 = vsel %vm229_vm8, %v178_v52, %v227_v53  ;;  %v1295_v52 = vld [vmem:[#allocation6 + $0xf4] ss:$8 sps:$4 sm:$0xff]   ;;  %v1293_v53 = vld [vmem:[#allocation6 + $0xf0] ss:$8 sps:$4 sm:$0xff]  }
  0xcc   :  { %1222 = vmatmul.mubr.msk.f32.vlgmr.msra.gmra.mxu0 %vm232_vm0, %v230_v54  ;;  %v1298_v54 = vld [vmem:[#allocation6 + $0x1f4] ss:$8 sps:$4 sm:$0xff]  }
  0xcd   :  { %950 = vmatpush1.bf16.msra.mxu0 %v1245_v60 }
  0xce   :  { %951 = vmatprep.subr.bf16.mxu0 %v1253_v3  ;;  %v1307_v3 = vld [vmem:[#allocation6 + $0xd4] ss:$8 sps:$4 sm:$0xff]  }
  0xd1   :  { %952 = vmatpush1.bf16.msra.mxu0 %v1251_v10  ;;  %v1310_v10 = vld [vmem:[#allocation6 + $0x1d4] ss:$8 sps:$4 sm:$0xff]  }
  0xd2   :  { %953 = vmatprep.subr.bf16.mxu0 %v1259_v16 }
  0xd5   :  { %954 = vmatpush1.bf16.msra.mxu0 %v1257_v18  ;;  %v1311_v18 = vld [vmem:[#allocation6 + $0xc0] ss:$8 sps:$4 sm:$0xff]  }
  0xd6   :  { %955 = vmatprep.subr.bf16.mxu0 %v1265_v22  ;;  %v1314_v22 = vld [vmem:[#allocation6 + $0x1c0] ss:$8 sps:$4 sm:$0xff]  }
  0xd9   :  { %956 = vmatpush1.bf16.msra.mxu0 %v1263_v26  ;;  %v1317_v26 = vld [vmem:[#allocation6 + $0xb0] ss:$8 sps:$4 sm:$0xff]  }
  0xda   :  { %957 = vmatprep.subr.bf16.mxu0 %v1271_v28  ;;  %v1320_v28 = vld [vmem:[#allocation6 + $0x1b0] ss:$8 sps:$4 sm:$0xff]  }
  0xdd   :  { %958 = vmatpush1.bf16.msra.mxu0 %v1269_v30  ;;  %v1323_v30 = vld [vmem:[#allocation6 + $0xa0] ss:$8 sps:$4 sm:$0xff]  }
  0xde   :  { %959 = vmatprep.subr.bf16.mxu0 %v1277_v32  ;;  %v1326_v32 = vld [vmem:[#allocation6 + $0x1a0] ss:$8 sps:$4 sm:$0xff]  }
  0xe1   :  { %960 = vmatpush1.bf16.msra.mxu0 %v1275_v34  ;;  %v1329_v34 = vld [vmem:[#allocation6 + $0x90] ss:$8 sps:$4 sm:$0xff]  }
  0xe2   :  { %961 = vmatprep.subr.bf16.mxu0 %v1283_v36  ;;  %v1332_v36 = vld [vmem:[#allocation6 + $0x190] ss:$8 sps:$4 sm:$0xff]  }
  0xe5   :  { %962 = vmatpush1.bf16.msra.mxu0 %v1281_v38  ;;  %v1335_v38 = vld [vmem:[#allocation6 + $0x80] ss:$8 sps:$4 sm:$0xff]  }
  0xe6   :  { %963 = vmatprep.subr.bf16.mxu0 %v1289_v48 }
  0xe9   :  { %964 = vmatpush1.bf16.msra.mxu0 %v1287_v49 }
  0xea   :  { %965 = vmatprep.subr.bf16.mxu0 %v1295_v52 }
  0xed   :  { %966 = vmatpush2.bf16.msra.mxu0 %v1293_v53 }
 0x18c   :  { %v305_v56 = vpop.f32.mrf.mxu0 }
 0x18d   :  { %vm309_vm9 = vcmp.ge.f32.partialorder %v305_v56, 0.0  ;;  %v310_v57 = vmul.f32 0.1, %v305_v56 }
 0x18e   :  { %v1223_v58 = vpop.f32.mrf.mxu0 }
 0x18f   :  { %v311_v59 = vsel %vm309_vm9, %v305_v56, %v310_v57  ;;  %v1574_v56 = vsub.s32 0, %v1548_v47  ;;  %v1301_v57 = vld [vmem:[#allocation6 + $0xe4] ss:$8 sps:$4 sm:$0xff]   ;;  %v1299_v58 = vld [vmem:[#allocation6 + $0xe0] ss:$8 sps:$4 sm:$0xff]  }
 0x190   :  { %1233 = vmatmul.mubr.msk.f32.vlgmr.msra.gmra.mxu1 %vm316_vm2, %v311_v59  ;;  %967 = vmatprep.subr.bf16.mxu0 %v1301_v57  ;;  %v1304_v59 = vld [vmem:[#allocation6 + $0x1e4] ss:$8 sps:$4 sm:$0xff]  }
 0x191   :  { %991 = vmatpush1.bf16.msra.mxu1 %v1248_v62  ;;  %968 = vmatpush2.bf16.msra.mxu0 %v1299_v58 }
 0x192   :  { %992 = vmatprep.subr.bf16.mxu1 %v1256_v7  ;;  %v1305_v7 = vld [vmem:[#allocation6 + $0xd0] ss:$8 sps:$4 sm:$0xff]   ;;  %969 = vmatprep.subr.bf16.mxu0 %v1307_v3 }
 0x195   :  { %993 = vmatpush1.bf16.msra.mxu1 %v1254_v11  ;;  %v1308_v11 = vld [vmem:[#allocation6 + $0x1d0] ss:$8 sps:$4 sm:$0xff]   ;;  %970 = vmatpush2.bf16.msra.mxu0 %v1305_v7 }
 0x196   :  { %994 = vmatprep.subr.bf16.mxu1 %v1262_v17  ;;  %v1313_v17 = vld [vmem:[#allocation6 + $0xc4] ss:$8 sps:$4 sm:$0xff]  }
 0x197   :  { %971 = vmatprep.subr.bf16.mxu0 %v1313_v17 }
 0x199   :  { %995 = vmatpush1.bf16.msra.mxu1 %v1260_v19  ;;  %v1316_v19 = vld [vmem:[#allocation6 + $0x1c4] ss:$8 sps:$4 sm:$0xff]   ;;  %972 = vmatpush2.bf16.msra.mxu0 %v1311_v18 }
 0x19a   :  { %996 = vmatprep.subr.bf16.mxu1 %v1268_v25  ;;  %v1319_v25 = vld [vmem:[#allocation6 + $0xb4] ss:$8 sps:$4 sm:$0xff]  }
 0x19b   :  { %973 = vmatprep.subr.bf16.mxu0 %v1319_v25 }
 0x19d   :  { %997 = vmatpush1.bf16.msra.mxu1 %v1266_v27  ;;  %v1322_v27 = vld [vmem:[#allocation6 + $0x1b4] ss:$8 sps:$4 sm:$0xff]   ;;  %974 = vmatpush2.bf16.msra.mxu0 %v1317_v26 }
 0x19e   :  { %998 = vmatprep.subr.bf16.mxu1 %v1274_v29  ;;  %v1325_v29 = vld [vmem:[#allocation6 + $0xa4] ss:$8 sps:$4 sm:$0xff]  }
 0x19f   :  { %975 = vmatprep.subr.bf16.mxu0 %v1325_v29 }
 0x1a1   :  { %999 = vmatpush1.bf16.msra.mxu1 %v1272_v31  ;;  %v1328_v31 = vld [vmem:[#allocation6 + $0x1a4] ss:$8 sps:$4 sm:$0xff]   ;;  %976 = vmatpush2.bf16.msra.mxu0 %v1323_v30 }
 0x1a2   :  { %1000 = vmatprep.subr.bf16.mxu1 %v1280_v33  ;;  %v1331_v33 = vld [vmem:[#allocation6 + $0x94] ss:$8 sps:$4 sm:$0xff]  }
 0x1a3   :  { %977 = vmatprep.subr.bf16.mxu0 %v1331_v33 }
 0x1a5   :  { %1001 = vmatpush1.bf16.msra.mxu1 %v1278_v35  ;;  %v1334_v35 = vld [vmem:[#allocation6 + $0x194] ss:$8 sps:$4 sm:$0xff]   ;;  %978 = vmatpush2.bf16.msra.mxu0 %v1329_v34 }
 0x1a6   :  { %1002 = vmatprep.subr.bf16.mxu1 %v1286_v37  ;;  %v1337_v37 = vld [vmem:[#allocation6 + $0x84] ss:$8 sps:$4 sm:$0xff]  }
 0x1a7   :  { %979 = vmatprep.subr.bf16.mxu0 %v1337_v37 }
 0x1a9   :  { %1003 = vmatpush1.bf16.msra.mxu1 %v1284_v39  ;;  %v1338_v39 = vld [vmem:[#allocation6 + $0x180] ss:$8 sps:$4 sm:$0xff]   ;;  %980 = vmatpush2.bf16.msra.mxu0 %v1335_v38 }
 0x1aa   :  { %1004 = vmatprep.subr.bf16.mxu1 %v1292_v50 }
 0x1ad   :  { %1005 = vmatpush1.bf16.msra.mxu1 %v1290_v51 }
 0x1ae   :  { %1006 = vmatprep.subr.bf16.mxu1 %v1298_v54 }
 0x1b1   :  { %1007 = vmatpush2.bf16.msra.mxu1 %v1296_v55 }
 0x1b2   :  { %1008 = vmatprep.subr.bf16.mxu1 %v1304_v59 }
 0x1b5   :  { %1009 = vmatpush2.bf16.msra.mxu1 %v1302_v61 }
 0x1b6   :  { %1010 = vmatprep.subr.bf16.mxu1 %v1310_v10 }
 0x1b9   :  { %1011 = vmatpush2.bf16.msra.mxu1 %v1308_v11 }
 0x1ba   :  { %1012 = vmatprep.subr.bf16.mxu1 %v1316_v19 }
 0x1bd   :  { %1013 = vmatpush2.bf16.msra.mxu1 %v1314_v22 }
 0x1be   :  { %1014 = vmatprep.subr.bf16.mxu1 %v1322_v27 }
 0x1c1   :  { %1015 = vmatpush2.bf16.msra.mxu1 %v1320_v28 }
 0x1c2   :  { %1016 = vmatprep.subr.bf16.mxu1 %v1328_v31 }
 0x1c5   :  { %1017 = vmatpush2.bf16.msra.mxu1 %v1326_v32 }
 0x1c6   :  { %1018 = vmatprep.subr.bf16.mxu1 %v1334_v35 }
 0x1c9   :  { %1019 = vmatpush2.bf16.msra.mxu1 %v1332_v36 }
 0x250   :  { %v398_v40 = vpop.f32.mrf.mxu1 }
 0x251   :  { %v403_v41 = vrot.slane %v398_v40, 2 }
 0x252   :  { %v1234_v42 = vpop.f32.mrf.mxu1 }
 0x253   :  { %v405_v43 = vadd.f32 %v403_v41, %v398_v40  ;;  %v1340_v40 = vld [vmem:[#allocation6 + $0x184] ss:$8 sps:$4 sm:$0xff]  }
 0x254   :  { %1020 = vmatprep.subr.bf16.mxu1 %v1340_v40 }
 0x255   :  { %v1145_v44 = vmul.f32 -1.442695, %v405_v43  ;;  %1021 = vmatpush2.bf16.msra.mxu1 %v1338_v39 }
 0x257   :  { %1341 = vpow2.f32 %v1145_v44 }
 0x264   :  { %v1342_v45 = vpop.eup %1341 }
 0x265   :  { %v409_v46 = vadd.f32 1.0, %v1342_v45 }
 0x267   :  { %1343 = vrcp.f32 %v409_v46 }
 0x274   :  { %v1344_v60 = vpop.eup %1343 }
 0x275   :  { %v415_v62 = vrot.slane %v1344_v60, %v1574_v56  ;;  %v434_v16 = vrot.slane %v1344_v60, %v1578_v63 }
 0x277   :  { %421 = vbcast.lane.b32.xlu1 %v415_v62, 264  ;;  %417 = vbcast.lane.b32.xlu0 %v415_v62, 256 }
 0x27b   :  { %436 = vbcast.lane.b32.xlu1 %v434_v16, 256  ;;  %425 = vbcast.lane.b32.xlu0 %v415_v62, 272 }
 0x27f   :  { %440 = vbcast.lane.b32.xlu1 %v434_v16, 264  ;;  %429 = vbcast.lane.b32.xlu0 %v415_v62, 280 }
 0x283   :  { %444 = vbcast.lane.b32.xlu1 %v434_v16, 272 }
 0x287   :  { %448 = vbcast.lane.b32.xlu1 %v434_v16, 280 }
 0x2e9   :  { %v422_v41 = vpop.permute.xlu1 %421  ;;  %v418_v42 = vpop.permute.xlu0 %417 }
 0x2ea   :  { %v1582_v43 = vmul.f32 %v422_v41, %v1484_v8  ;;  %v1585_v44 = vmul.f32 %v422_v41, %v1486_v9  ;;  %v1588_v45 = vmul.f32 %v418_v42, %v1472_v2  ;;  %v1591_v46 = vmul.f32 %v418_v42, %v1476_v4 }
 0x2ec   :  { %v466_v8 = vmax.f32 %v1588_v45, %v1582_v43  ;;  %v475_v9 = vmax.f32 %v1591_v46, %v1585_v44  ;;  %v502_v2 = vadd.f32 %v1582_v43, %v1588_v45  ;;  %v511_v4 = vadd.f32 %v1585_v44, %v1591_v46 }
 0x2ed   :  { %v437_v48 = vpop.permute.xlu1 %436  ;;  %v426_v49 = vpop.permute.xlu0 %425 }
 0x2ee   :  { %v1594_v50 = vmul.f32 %v426_v49, %v1496_v14  ;;  %v1597_v51 = vmul.f32 %v426_v49, %v1498_v15 }
 0x2f0   :  { %v467_v57 = vmax.f32 %v466_v8, %v1594_v50  ;;  %v476_v58 = vmax.f32 %v475_v9, %v1597_v51  ;;  %v503_v59 = vadd.f32 %v502_v2, %v1594_v50  ;;  %v512_v60 = vadd.f32 %v511_v4, %v1597_v51 }
 0x2f1   :  { %v441_v52 = vpop.permute.xlu1 %440  ;;  %v430_v53 = vpop.permute.xlu0 %429 }
 0x2f2   :  { %v1608_v14 = vmul.f32 %v441_v52, %v1478_v5  ;;  %v1611_v15 = vmul.f32 %v441_v52, %v1480_v6  ;;  %v1614_v54 = vmul.f32 %v430_v53, %v1514_v23  ;;  %v1617_v55 = vmul.f32 %v430_v53, %v1516_v24 }
 0x2f3   :  { %v1624_v5 = vmul.f32 %v437_v48, %v1468_v0  ;;  %v1627_v6 = vmul.f32 %v437_v48, %v1470_v1 }
 0x2f4   :  { %v468_v23 = vmax.f32 %v467_v57, %v1614_v54  ;;  %v477_v61 = vmax.f32 %v476_v58, %v1617_v55  ;;  %v504_v24 = vadd.f32 %v503_v59, %v1614_v54  ;;  %v513_v62 = vadd.f32 %v512_v60, %v1617_v55 }
 0x2f5   :  { %v445_v3 = vpop.permute.xlu1 %444  ;;  %v484_v7 = vmax.f32 %v1624_v5, %v1608_v14  ;;  %v493_v10 = vmax.f32 %v1627_v6, %v1611_v15  ;;  %v520_v19 = vadd.f32 %v1608_v14, %v1624_v5  ;;  %v529_v22 = vadd.f32 %v1611_v15, %v1627_v6 }
 0x2f6   :  { %v1638_v0 = vmul.f32 %v445_v3, %v1492_v12  ;;  %v1641_v1 = vmul.f32 %v445_v3, %v1494_v13  ;;  %v469_v11 = vrot.slane %v468_v23, 4  ;;  %v478_v16 = vrot.slane %v477_v61, 4 }
 0x2f7   :  { %v505_v17 = vrot.slane %v504_v24, 4  ;;  %v514_v18 = vrot.slane %v513_v62, 4 }
 0x2f8   :  { %v485_v25 = vmax.f32 %v484_v7, %v1638_v0  ;;  %v494_v26 = vmax.f32 %v493_v10, %v1641_v1  ;;  %v470_v27 = vmax.f32 %v468_v23, %v469_v11  ;;  %v479_v12 = vmax.f32 %v477_v61, %v478_v16 }
 0x2f9   :  { %v506_v28 = vadd.f32 %v505_v17, %v504_v24  ;;  %v515_v29 = vadd.f32 %v514_v18, %v513_v62  ;;  %v449_v13 = vpop.permute.xlu1 %448  ;;  %v521_v30 = vadd.f32 %v520_v19, %v1638_v0  ;;  %v530_v31 = vadd.f32 %v529_v22, %v1641_v1 }
 0x2fa   :  { %v1652_v32 = vmul.f32 %v449_v13, %v1508_v20  ;;  %v1655_v33 = vmul.f32 %v449_v13, %v1510_v21  ;;  %v471_v34 = vrot.slane %v470_v27, 2  ;;  %v480_v35 = vrot.slane %v479_v12, 2 }
 0x2fb   :  { %v507_v36 = vrot.slane %v506_v28, 2  ;;  %v516_v37 = vrot.slane %v515_v29, 2 }
 0x2fc   :  { %v486_v38 = vmax.f32 %v485_v25, %v1652_v32  ;;  %v495_v39 = vmax.f32 %v494_v26, %v1655_v33  ;;  %v522_v40 = vadd.f32 %v521_v30, %v1652_v32  ;;  %v531_v41 = vadd.f32 %v530_v31, %v1655_v33 }
 0x2fd   :  { %v508_v42 = vadd.f32 %v507_v36, %v506_v28  ;;  %v517_v48 = vadd.f32 %v516_v37, %v515_v29  ;;  %v472_v21 = vmax.f32 %v470_v27, %v471_v34  ;;  %v481_v2 = vmax.f32 %v479_v12, %v480_v35 }
 0x2fe   :  { %v487_v49 = vrot.slane %v486_v38, 4  ;;  %v496_v20 = vrot.slane %v495_v39, 4  ;;  %v523_v8 = vrot.slane %v522_v40, 4  ;;  %v532_v9 = vrot.slane %v531_v41, 4 }
 0x2ff   :  { %v509_v58 = vrot.slane %v508_v42, 1  ;;  %v518_v59 = vrot.slane %v517_v48, 1  ;;  %v473_v62 = vrot.slane %v472_v21, 1  ;;  %v482_v3 = vrot.slane %v481_v2, 1 }
 0x300   :  { %v488_v4 = vmax.f32 %v486_v38, %v487_v49  ;;  %v497_v52 = vmax.f32 %v495_v39, %v496_v20  ;;  %v524_v53 = vadd.f32 %v523_v8, %v522_v40  ;;  %v533_v57 = vadd.f32 %v532_v9, %v531_v41 }
 0x301   :  { %v510_v17 = vadd.f32 %v509_v58, %v508_v42  ;;  %v519_v18 = vadd.f32 %v518_v59, %v517_v48  ;;  %v474_v27 = vmax.f32 %v472_v21, %v473_v62  ;;  %v483_v12 = vmax.f32 %v481_v2, %v482_v3 }
 0x302   :  { %v489_v60 = vrot.slane %v488_v4, 2  ;;  %v498_v23 = vrot.slane %v497_v52, 2  ;;  %v525_v61 = vrot.slane %v524_v53, 2  ;;  %v534_v24 = vrot.slane %v533_v57, 2 }
 0x303   :  { %v539_v31 = vmul.f32 0.03125, %v510_v17  ;;  %v540_v34 = vmul.f32 0.03125, %v519_v18  ;;  %v628_v20 = vstv %s1699_s4  ;;  %s1428_s4 = smov [#allocation8]  }
 0x304   :  { %v490_v7 = vmax.f32 %v488_v4, %v489_v60  ;;  %v499_v10 = vmax.f32 %v497_v52, %v498_v23  ;;  %v526_v11 = vadd.f32 %v525_v61, %v524_v53  ;;  %v535_v16 = vadd.f32 %v534_v24, %v533_v57  ;;  %s1125_s15 = sshll.u32 %s1428_s4, 4  ;;  %s1126_s15 = int_to_ptr.vmem [resolvable:$true] %s1125_s15 }
 0x305   :  { %s1393_s16 = scalar_lea.vmem %s1126_s15, 2048  ;;  %p1398_p11 = scmp.lt.s32.totalorder %s1126_s15, %s1126_s15 }
 0x306   :  { %v491_v19 = vrot.slane %v490_v7, 1  ;;  %v527_v22 = vrot.slane %v526_v11, 1  ;;  %v536_v25 = vrot.slane %v535_v16, 1  ;;  %v500_v26 = vrot.slane %v499_v10, 1  ;;  %p1394_p10 = scmp.ne.s32.totalorder %s1126_s15, %s1393_s16  ;;  %p1399_p12 = scmp.lt.s32.totalorder %s1393_s16, %s1393_s16 }
 0x308   :  { %v492_v28 = vmax.f32 %v490_v7, %v491_v19  ;;  %v528_v29 = vadd.f32 %v527_v22, %v526_v11  ;;  %v501_v13 = vmax.f32 %v499_v10, %v500_v26  ;;  %v537_v30 = vadd.f32 %v536_v25, %v535_v16  ;;  %p1400_p13 = por %p1399_p12, %p1398_p11 }
 0x309   :  { %v1427_v11 = vmov 1966171168  }
 0x30a   :  { %v541_v35 = vmul.f32 0.03125, %v528_v29  ;;  %v548_v36 = vsel %vm177_vm6, %v501_v13, %v483_v12  ;;  %v547_v37 = vsel %vm177_vm6, %v492_v28, %v474_v27  ;;  %v542_v38 = vmul.f32 0.03125, %v537_v30  ;;  %p1401_p0 = pnand %p1400_p13, %p1394_p10 }
 0x30b   :  { %v560_v39 = vpack.c.bf16 %v548_v36, %v548_v36  ;;  %v559_v40 = vpack.c.bf16 %v547_v37, %v547_v37  ;;  %v1047_v16 = vunpack.c.l.s4 %v1427_v11 }
 0x30c   :  { %v556_v41 = vsel %vm177_vm6, %v542_v38, %v540_v34  ;;  %v555_v42 = vsel %vm177_vm6, %v541_v35, %v539_v31 }
 0x30d   :  { %981 = vmatprep.mubr.bf16.mxu0 %v560_v39  ;;  %v562_v48 = vpack.c.bf16 %v556_v41, %v556_v41  ;;  %v561_v49 = vpack.c.bf16 %v555_v42, %v555_v42  ;;  %v1048_v17 = vunpack.c.0.s8 %v1047_v16 }
 0x30e   :  { %982 = vmatmul.mubr.bf16.vlgmr.msra.gmra.mxu0 %v559_v40 }
 0x30f   :  { %1022 = vmatprep.mubr.bf16.mxu1 %v562_v48  ;;  %v1051_v19 = vsub.s32 %v1048_v17, %v1548_v47 }
 0x310   :  { %1023 = vmatmul.mubr.bf16.vlgmr.msra.gmra.mxu1 %v561_v49 }
 0x3ce   :  { %v983_v8 = vpop.f32.mrf.mxu0 }
 0x3cf   :  { %v984_v9 = vadd.f32 %v983_v8, %v628_v20 }
 0x3d0   :  { %v985_v21 = vpop.f32.mrf.mxu0  ;;  %v1024_v2 = vpop.f32.mrf.mxu1 }
 0x3d1   :  { %v986_v4 = vadd.f32 %v985_v21, %v628_v20  ;;  %v1025_v52 = vadd.f32 %v1024_v2, %v984_v9 }
 0x3d2   :  { %v987_v53 = vpop.f32.mrf.mxu0  ;;  %v1026_v57 = vpop.f32.mrf.mxu1 }
 0x3d3   :  { %v1210_v58 = vmul.f32 -1.442695, %v1025_v52  ;;  %v1027_v59 = vadd.f32 %v1026_v57, %v986_v4 }
 0x3d4   :  { %v988_v60 = vpop.f32.mrf.mxu0  ;;  %v1028_v23 = vpop.f32.mrf.mxu1 }
 0x3d5   :  { %1345 = vpow2.f32 %v1210_v58  ;;  %v1211_v61 = vmul.f32 -1.442695, %v1027_v59 }
 0x3d6   :  { %v1029_v24 = vpop.f32.mrf.mxu1 }
 0x3d7   :  { %1347 = vpow2.f32 %v1211_v61 }
 0x3e2   :  { %v1346_v62 = vpop.eup %1345 }
 0x3e3   :  { %v1037_v3 = vadd.f32 1.0, %v1346_v62 }
 0x3e4   :  { %v1348_v7 = vpop.eup %1347 }
 0x3e5   :  { %v1038_v10 = vadd.f32 1.0, %v1348_v7  ;;  %1349 = vrcp.f32 %v1037_v3 }
 0x3e7   :  { %1351 = vrcp.f32 %v1038_v10 }
 0x3f2   :  { %v1350_v18 = vpop.eup %1349 }
 0x3f4   :  { %v1352_v22 = vpop.eup %1351 }
 0x3f5   :  { %v1045_v25 = vcombine.low %v1350_v18, %v1352_v22 }
 0x3f7   :  { %v1052_v26 = vrot.slane %v1045_v25, %v1051_v19 }
 0x3f9   :  { %v1053_v27 = vcombine.high %v1052_v26, %v1052_v26  ;;  %v1060_v12 = vrot.slane %v1052_v26, %v1051_v19 }
 0x3fb   :  { %v1067_v28 = vrot.slane %v1053_v27, %v1051_v19  ;;  %v1071_v29 = vrot.slane %v1060_v12, %v1574_v56  ;;  %v1075_v13 = vrot.slane %v1060_v12, %v1578_v63 }
 0x3fd   :  { %v1079_v30 = vrot.slane %v1067_v28, %v1574_v56  ;;  %v1083_v31 = vrot.slane %v1067_v28, %v1578_v63  ;;  %v1088_v34 = vmul.f32 %v1071_v29, %v1588_v45  ;;  %v1089_v35 = vmul.f32 %v1075_v13, %v1591_v46 }
 0x3fe   :  { %v1090_v47 = vmul.f32 %v1071_v29, %v1582_v43  ;;  %v1091_v36 = vmul.f32 %v1075_v13, %v1585_v44  ;;  %v1092_v37 = vmul.f32 %v1071_v29, %v1594_v50  ;;  %v1093_v38 = vmul.f32 %v1075_v13, %v1597_v51 }
 0x3ff   :  { %v1094_v39 = vmul.f32 %v1071_v29, %v1614_v54  ;;  %v1095_v56 = vmul.f32 %v1075_v13, %v1617_v55  ;;  %v1096_v63 = vmul.f32 %v1079_v30, %v1624_v5  ;;  %v1097_v45 = vmul.f32 %v1083_v31, %v1627_v6  ;;  %1104 = vst [vmem:[#allocation8] sm:$0xff] %v1088_v34 }
 0x400   :  { %1105 = vst [vmem:[#allocation8 + $0x8] sm:$0xff] %v1089_v35  ;;  %v1098_v43 = vmul.f32 %v1079_v30, %v1608_v14  ;;  %v1099_v44 = vmul.f32 %v1083_v31, %v1611_v15  ;;  %v1100_v46 = vmul.f32 %v1079_v30, %v1638_v0  ;;  %v1101_v50 = vmul.f32 %v1083_v31, %v1641_v1 }
 0x401   :  { %1106 = vst [vmem:[#allocation8 + $0x10] sm:$0xff] %v1090_v47  ;;  %1107 = vst [vmem:[#allocation8 + $0x18] sm:$0xff] %v1091_v36  ;;  %v1102_v51 = vmul.f32 %v1079_v30, %v1652_v32  ;;  %v1103_v54 = vmul.f32 %v1083_v31, %v1655_v33 }
 0x402   :  { %1108 = vst [vmem:[#allocation8 + $0x20] sm:$0xff] %v1092_v37  ;;  %1109 = vst [vmem:[#allocation8 + $0x28] sm:$0xff] %v1093_v38 }
 0x403   :  { %1110 = vst [vmem:[#allocation8 + $0x30] sm:$0xff] %v1094_v39  ;;  %1111 = vst [vmem:[#allocation8 + $0x38] sm:$0xff] %v1095_v56 }
 0x404   :  { %1112 = vst [vmem:[#allocation8 + $0x40] sm:$0xff] %v1096_v63  ;;  %1113 = vst [vmem:[#allocation8 + $0x48] sm:$0xff] %v1097_v45 }
 0x405   :  { %1114 = vst [vmem:[#allocation8 + $0x50] sm:$0xff] %v1098_v43  ;;  %1115 = vst [vmem:[#allocation8 + $0x58] sm:$0xff] %v1099_v44 }
 0x406   :  { %1116 = vst [vmem:[#allocation8 + $0x60] sm:$0xff] %v1100_v46  ;;  %1117 = vst [vmem:[#allocation8 + $0x68] sm:$0xff] %v1101_v50 }
 0x407   :  { %1118 = vst [vmem:[#allocation8 + $0x70] sm:$0xff] %v1102_v51  ;;  %1119 = vst [vmem:[#allocation8 + $0x78] sm:$0xff] %v1103_v54 }
 0x408   :  { %1404 = shalt.err (!%p1401_p0)
}
 0x409   :  { %1131 = dma.vmem_to_hbm [thread:$0]  %s1126_s15, 2048, %s1700_s5, [#allocation5], %s1420_s21, %s1420_s21, %s1421_s22  }
 0x40a   :  { %1417 = dma.done.wait [#allocation5], 2048  }
 0x40b   :  { %1418 = vsyncadd [#allocation5], 4294965248 }
 0x40c   :  { %1135 = vsyncpa [#allocation4], 1 }
 0x40d   :  { %1136 = vsyncpa [#allocation7], 1 }
 0x40e   :  { %1137 = vsyncpa [#allocation5], 1 }

</bundles_post_ra>
